<compile_context>
chip_gen: v7x
topology: tpu7x:2x2x1
jax: 0.10.0
libtpu: 0.0.40
codegen_flags: <defaults>
</compile_context>

<pallas_src>
import functools

import jax
import jax.numpy as jnp
from jax.experimental import pallas as pl
from jax.experimental.pallas import tpu as pltpu


# -----------------------------------------------------------------------------
# Tunables
# -----------------------------------------------------------------------------
# Below this total size, a standalone Pallas custom call is not worth the
# launch/per-step overhead and XLA can fuse the transpose into neighbours.
# Kept deliberately small so the self-test below still exercises the kernel;
# production would likely raise this to ~2-4 MiB.
_SMALL_BYPASS_BYTES = 64 * 1024

# Target VMEM footprint per pipeline buffer (input tile == output tile size).
# ~2 MiB sits near the measured ~85%-of-HBM-roofline plateau while fitting,
# double-buffered for both input and output, inside every generation's scoped
# VMEM (16 MiB v5e / 32 MiB v6e / 32-of-64 MiB v7x).
_TARGET_TILE_VMEM_BYTES = 2 << 20

# Sublane tile (second-to-last dim granularity) per element size.
_SUBLANE = {4: 8, 2: 16, 1: 32}


def _sublane(itemsize: int) -> int:
    return _SUBLANE.get(itemsize, 8)


def _choose_t_tile(T: int, bytes_per_t_row: int, itemsize: int,
                   target_bytes: int) -> int:
    """Rows along T per tile: ~target_bytes per buffer, sublane-aligned."""
    sub = _sublane(itemsize)
    raw = max(1, int(target_bytes) // max(int(bytes_per_t_row), 1))
    if raw >= T or T <= sub:
        return T                          # whole-dim block: always layout-legal
    tt = max(sub, (raw // sub) * sub)     # keep blocked T dim sublane-aligned
    return min(tt, T)


def _compiler_params(n_grid_dims: int, vmem_needed_bytes: int):
    # All grid axes are independent tile copies -> "parallel" everywhere, so
    # the grid also shards across v7x's two TensorCores (no-op on v5e/v6e).
    vmem_limit = int(min(max(int(vmem_needed_bytes * 1.5), 16 << 20), 48 << 20))
    return pltpu.CompilerParams(
        dimension_semantics=("parallel",) * n_grid_dims,
        vmem_limit_bytes=vmem_limit,
    )


# -----------------------------------------------------------------------------
# einops order parsing (simple whitespace tokens -> axis permutation)
# -----------------------------------------------------------------------------
def _parse_einops_permutation(order: str):
    lhs, rhs = order.split("->")
    src = lhs.split()
    dst = rhs.split()
    if sorted(src) != sorted(dst):
        raise ValueError(f"unsupported einops order: {order!r}")
    return tuple(src.index(a) for a in dst)


# -----------------------------------------------------------------------------
# Path 1: H*W is a multiple of 128 -> lane-dense flattened kernel.
#   input viewed as (S, T, C*HW), output as (S, C, T, HW); each grid step
#   copies a (tt, C*HW) slab into a (C, tt, HW) slab via C unrolled,
#   128-aligned lane-slice copies (pure vld/vst, no relayout, unmasked stores).
# -----------------------------------------------------------------------------
def _make_lane_split_kernel(C: int, HW: int):
    def kernel(x_ref, o_ref):
        # x_ref: (tt, C*HW)   one T-tile of one stream, channels along lanes
        # o_ref: (C, tt, HW)  channel-major output tile for the same T-tile
        for c in range(C):                      # C is small & static -> unroll
            o_ref[c, :, :] = x_ref[:, c * HW:(c + 1) * HW]
    return kernel


@functools.partial(jax.jit, static_argnames=("tile_bytes",))
def _permute_lane_aligned(video, *, tile_bytes=_TARGET_TILE_VMEM_BYTES):
    """'S T C H W -> S C T H W' when H*W % 128 == 0."""
    S, T, C, H, W = video.shape
    HW = H * W
    itemsize = video.dtype.itemsize
    nbytes = video.size * itemsize

    tt = _choose_t_tile(T, C * HW * itemsize, itemsize, tile_bytes)
    tile_bytes_actual = tt * C * HW * itemsize        # == output tile size
    grid = (S, pl.cdiv(T, tt))

    x2 = video.reshape(S, T, C * HW)                  # free row-major view

    out = pl.pallas_call(
        _make_lane_split_kernel(C, HW),
        out_shape=jax.ShapeDtypeStruct((S, C, T, HW), video.dtype),
        grid=grid,
        in_specs=[
            # contiguous (tt, C*HW) read per step; last dim is the full array
            # dim, blocked T dim is sublane-aligned (or full).
            pl.BlockSpec((None, tt, C * HW), lambda s, t: (s, t, 0)),
        ],
        # lane-dense (C, tt, HW) writeback; HW is a 128-multiple -> unmasked vst.
        out_specs=pl.BlockSpec((None, C, tt, HW), lambda s, t: (s, 0, t, 0)),
        compiler_params=_compiler_params(len(grid), 2 * 2 * tile_bytes_actual),
        cost_estimate=pl.CostEstimate(
            flops=0, transcendentals=0, bytes_accessed=2 * nbytes),
    )(x2)

    return out.reshape(S, C, T, H, W)                 # free row-major view


# -----------------------------------------------------------------------------
# Path 2: arbitrary H, W -> the channel split is done by the grid/DMA and the
#   kernel body is a plain copy.  Blocks keep the full (H, W) as their last two
#   dims, so there is no 128-alignment requirement at all.
# -----------------------------------------------------------------------------
def _copy_channel_kernel(x_ref, o_ref):
    # x_ref: (tt, 1, H, W)  -- one channel of one stream's T-tile
    # o_ref: (1, tt, H, W)  -- same data, channel-major
    o_ref[0] = x_ref[:, 0]


@functools.partial(jax.jit, static_argnames=("tile_bytes",))
def _permute_generic(video, *, tile_bytes=_TARGET_TILE_VMEM_BYTES):
    """'S T C H W -> S C T H W' for arbitrary spatial dims."""
    S, T, C, H, W = video.shape
    itemsize = video.dtype.itemsize
    nbytes = video.size * itemsize
    sub = _sublane(itemsize)

    # The VMEM layout pads H up to the sublane tile and W up to 128 lanes;
    # size the T-tile from the *padded* footprint so small spatial dims cannot
    # blow the VMEM budget.
    padded_row = (pl.cdiv(H, sub) * sub) * (pl.cdiv(W, 128) * 128) * itemsize
    tt = _choose_t_tile(T, padded_row, itemsize, tile_bytes)
    tile_bytes_actual = tt * padded_row
    grid = (S, C, pl.cdiv(T, tt))

    out = pl.pallas_call(
        _copy_channel_kernel,
        out_shape=jax.ShapeDtypeStruct((S, C, T, H, W), video.dtype),
        grid=grid,
        in_specs=[
            # tt strided runs of H*W contiguous elements per step (strided DMA).
            pl.BlockSpec((None, tt, 1, H, W), lambda s, c, t: (s, t, c, 0, 0)),
        ],
        # fully contiguous tt*H*W writeback per step.
        out_specs=pl.BlockSpec((None, 1, tt, H, W), lambda s, c, t: (s, c, t, 0, 0)),
        compiler_params=_compiler_params(len(grid), 2 * 2 * tile_bytes_actual),
        cost_estimate=pl.CostEstimate(
            flops=0, transcendentals=0, bytes_accessed=2 * nbytes),
    )(video)

    return out


# -----------------------------------------------------------------------------
# Dispatcher
# -----------------------------------------------------------------------------
def permute_video(video: jax.Array, perm: tuple) -> jax.Array:
    if perm == tuple(range(video.ndim)):
        return video                                  # identity permutation
    if video.size * video.dtype.itemsize < _SMALL_BYPASS_BYTES:
        # Tiny tensors: launch + per-step overhead dominates, let XLA fuse.
        return jnp.transpose(video, perm)
    if video.ndim == 5 and perm == (0, 2, 1, 3, 4):
        S, T, C, H, W = video.shape
        if (H * W) % 128 == 0:
            return _permute_lane_aligned(video)
        return _permute_generic(video)
    # TODO(synk): other einops permutations are not hand-kernelized; XLA's
    # transpose is still correct and contiguous for them.
    return jnp.transpose(video, perm)


# -----------------------------------------------------------------------------
# Module wrapper mirroring PermuteStreams.forward
# -----------------------------------------------------------------------------
class PermuteStreams:
    def __init__(self, einops_order_audio: str, einops_order_rgb: str) -> None:
        # einops_order_audio is stored but never used in forward (matches the
        # reference module, which only permutes item['video']).
        self.einops_order_audio = einops_order_audio
        self.einops_order_rgb = einops_order_rgb
        self._perm_rgb = (_parse_einops_permutation(einops_order_rgb)
                          if einops_order_rgb is not None else None)

    def __call__(self, item: dict) -> dict:
        if self.einops_order_rgb is not None:
            item["video"] = permute_video(item["video"], self._perm_rgb)
        return item


# -----------------------------------------------------------------------------
# Main
# -----------------------------------------------------------------------------
if __name__ == "__main__":
    key = jax.random.PRNGKey(0)
    k1, k2, k3, k4 = jax.random.split(key, 4)

    module = PermuteStreams(
        einops_order_audio="S F T -> S T F",
        einops_order_rgb="S T C H W -> S C T H W",
    )

    # Case 1: lane-aligned spatial dims (H*W % 128 == 0) -> flattened kernel.
    S, T, C, H, W = 2, 16, 3, 16, 16
    video = jax.random.normal(k1, (S, T, C, H, W), dtype=jnp.float32)
    audio = jax.random.normal(k2, (S, 128, 16), dtype=jnp.float32)
    out_item = module({"video": video, "audio": audio})
    got = jax.block_until_ready(out_item["video"])
    ref = jnp.transpose(video, (0, 2, 1, 3, 4))
    assert got.shape == (S, C, T, H, W), got.shape
    assert got.dtype == video.dtype, got.dtype
    assert bool(jnp.array_equal(got, ref)), "aligned-path permutation mismatch"
    # audio passes through untouched, exactly as in the PyTorch forward.
    assert bool(jnp.array_equal(out_item["audio"], audio))

    # Case 2: non-128-multiple H*W (14x14 patches, bf16) -> generic copy kernel.
    S2, T2, C2, H2, W2 = 2, 48, 3, 14, 14
    video2 = jax.random.normal(k3, (S2, T2, C2, H2, W2), dtype=jnp.bfloat16)
    out2 = module({"video": video2})
    got2 = jax.block_until_ready(out2["video"])
    ref2 = jnp.transpose(video2, (0, 2, 1, 3, 4))
    assert got2.shape == (S2, C2, T2, H2, W2), got2.shape
    assert got2.dtype == video2.dtype, got2.dtype
    assert bool(jnp.array_equal(got2, ref2)), "generic-path permutation mismatch"

    # Case 3: force T-tiling with a partial boundary tile (tt=16 over T=36) to
    # exercise the tiled pipeline + boundary masking on the aligned path.
    S3, T3, C3, H3, W3 = 2, 36, 3, 16, 16
    video3 = jax.random.normal(k4, (S3, T3, C3, H3, W3), dtype=jnp.float32)
    got3 = jax.block_until_ready(
        _permute_lane_aligned(video3, tile_bytes=64 * 1024))
    ref3 = jnp.transpose(video3, (0, 2, 1, 3, 4))
    assert bool(jnp.array_equal(got3, ref3)), "tiled-path permutation mismatch"

    print("KERNEL_OK")
</pallas_src>

<mosaic_0001>
module attributes {stable_mosaic.version = 11 : i64} {
  func.func @kernel(%arg0: i32, %arg1: i32, %arg2: memref<1x16x768xf32, #tpu.memory_space<vmem>>, %arg3: memref<1x3x16x256xf32, #tpu.memory_space<vmem>>) attributes {dimension_semantics = [#tpu.dimension_semantics<parallel>, #tpu.dimension_semantics<parallel>], iteration_bounds = array<i64: 2, 1>, scalar_prefetch = 0 : i64, scratch_operands = 0 : i64, tpu.core_type = #tpu.core_type<tc>, window_params = [{transform_indices = @transform_0, window_bounds = array<i64: 1, 16, 768>}, {transform_indices = @transform_1, window_bounds = array<i64: 1, 3, 16, 256>}]} {
    %c0 = arith.constant 0 : index
    %c0_0 = arith.constant 0 : index
    %c0_1 = arith.constant 0 : index
    %0 = vector.load %arg2[%c0, %c0_0, %c0_1] : memref<1x16x768xf32, #tpu.memory_space<vmem>>, vector<1x16x256xf32>
    %1 = vector.shape_cast %0 : vector<1x16x256xf32> to vector<16x256xf32>
    %c0_2 = arith.constant 0 : index
    %c0_3 = arith.constant 0 : index
    %c0_4 = arith.constant 0 : index
    %c0_5 = arith.constant 0 : index
    %2 = vector.load %arg3[%c0_2, %c0_3, %c0_4, %c0_5] : memref<1x3x16x256xf32, #tpu.memory_space<vmem>>, vector<1x1x16x256xf32>
    %3 = vector.shape_cast %2 : vector<1x1x16x256xf32> to vector<16x256xf32>
    %4 = vector.shape_cast %1 : vector<16x256xf32> to vector<1x1x16x256xf32>
    tpu.vector_store %arg3[%c0_2, %c0_3, %c0_4, %c0_5], %4 {strides = array<i32>} : memref<1x3x16x256xf32, #tpu.memory_space<vmem>>, vector<1x1x16x256xf32>,
    %c0_6 = arith.constant 0 : index
    %c0_7 = arith.constant 0 : index
    %c256 = arith.constant 256 : index
    %5 = vector.load %arg2[%c0_6, %c0_7, %c256] : memref<1x16x768xf32, #tpu.memory_space<vmem>>, vector<1x16x256xf32>
    %6 = vector.shape_cast %5 : vector<1x16x256xf32> to vector<16x256xf32>
    %c0_8 = arith.constant 0 : index
    %c1 = arith.constant 1 : index
    %c0_9 = arith.constant 0 : index
    %c0_10 = arith.constant 0 : index
    %7 = vector.load %arg3[%c0_8, %c1, %c0_9, %c0_10] : memref<1x3x16x256xf32, #tpu.memory_space<vmem>>, vector<1x1x16x256xf32>
    %8 = vector.shape_cast %7 : vector<1x1x16x256xf32> to vector<16x256xf32>
    %9 = vector.shape_cast %6 : vector<16x256xf32> to vector<1x1x16x256xf32>
    tpu.vector_store %arg3[%c0_8, %c1, %c0_9, %c0_10], %9 {strides = array<i32>} : memref<1x3x16x256xf32, #tpu.memory_space<vmem>>, vector<1x1x16x256xf32>,
    %c0_11 = arith.constant 0 : index
    %c0_12 = arith.constant 0 : index
    %c512 = arith.constant 512 : index
    %10 = vector.load %arg2[%c0_11, %c0_12, %c512] : memref<1x16x768xf32, #tpu.memory_space<vmem>>, vector<1x16x256xf32>
    %11 = vector.shape_cast %10 : vector<1x16x256xf32> to vector<16x256xf32>
    %c0_13 = arith.constant 0 : index
    %c2 = arith.constant 2 : index
    %c0_14 = arith.constant 0 : index
    %c0_15 = arith.constant 0 : index
    %12 = vector.load %arg3[%c0_13, %c2, %c0_14, %c0_15] : memref<1x3x16x256xf32, #tpu.memory_space<vmem>>, vector<1x1x16x256xf32>
    %13 = vector.shape_cast %12 : vector<1x1x16x256xf32> to vector<16x256xf32>
    %14 = vector.shape_cast %11 : vector<16x256xf32> to vector<1x1x16x256xf32>
    tpu.vector_store %arg3[%c0_13, %c2, %c0_14, %c0_15], %14 {strides = array<i32>} : memref<1x3x16x256xf32, #tpu.memory_space<vmem>>, vector<1x1x16x256xf32>,
    return
  }
  func.func @transform_0(%arg0: i32, %arg1: i32) -> (i32, i32, i32) {
    %c0_i32 = arith.constant 0 : i32
    %c0_i32_0 = arith.constant 0 : i32
    return %arg0, %arg1, %c0_i32 : i32, i32, i32
  }
  func.func @transform_1(%arg0: i32, %arg1: i32) -> (i32, i32, i32, i32) {
    %c0_i32 = arith.constant 0 : i32
    %c0_i32_0 = arith.constant 0 : i32
    %c0_i32_1 = arith.constant 0 : i32
    return %arg0, %c0_i32, %arg1, %c0_i32_0 : i32, i32, i32, i32
  }
}

</mosaic_0001>

<bundles_post_ra>
// kernel: _permute_lane_aligned.1
= control target key start
LH: loop header
LB: loop body
LE: loop exit
PB: predicated region body
PF: predicated region fallthrough
CT: control target
= control target key end

     0   :  { %s359_s6 = smov 0   ;;  %s361_s7 = smov 0   ;;  %s392_s0 = inlined_call_operand.vmem [shape: f32[2,16,768], index: 0, kind: input, shape index: {}]   ;;  %s393_s1 = inlined_call_operand.vmem [shape: f32[2,3,16,256], index: 1, kind: output, shape index: {}]  }
   0x1   :  { %s363_s8 = smov 0  }
   0x2 LB: > { %s23_s9 = sadd.s32 1, %s343_s7  ;;  %p287_p0 = scmp.ge.s32.totalorder %s347_s8, 1  ;;  %s347_s8 = sphi %s363_s8, %s11_s8   ;;  %s343_s7 = sphi %s361_s7, %s395_s7   ;;  %s339_s6 = sphi %s359_s6, %s394_s6  }
   0x3   : > { %p25_p1 = scmp.ge.s32.totalorder %s23_s9, 2  ;;  %p109_p2 = scmp.lt.s32.totalorder %s347_s8, 3 }
   0x5   : > { %s397_s9 = smov (%p25_p1, %s23_s9), 0  ;;  %p110_p3 = pnand %p287_p0, %p109_p2 }
   0x6   : > { %p140_p4 = scmp.lt.s32.totalorder (!%p110_p3), %s339_s6, 1 }
   0x7   : > { %113 = sbr.rel (%p110_p3) target bundleno = 25 (0x19), region = 24 }
   0xe   : > { %s399_s6 = smov (!%p140_p4, %s339_s6), 1 }
   0xf   : > { %s300_s10 = smul.u32 96, %s399_s6 }
  0x11   : > { %s148_s13 = scalar_lea.vmem %s392_s0, %s300_s10  ;;  %s159_s16 = scalar_lea.vmem %s393_s1, %s300_s10 }
  0x12   : > { %v161_v0 = vld [vmem:[%s148_s13] sm:$0xff]  ;;  %v162_v1 = vld [vmem:[%s148_s13 + $0x8] sm:$0xff]  ;;  %v163_v2 = vld [vmem:[%s148_s13 + $0x30] sm:$0xff] }
  0x13   : > { %165 = vst [vmem:[%s159_s16] sm:$0xff] %v161_v0  ;;  %166 = vst [vmem:[%s159_s16 + $0x8] sm:$0xff] %v162_v1  ;;  %v164_v3 = vld [vmem:[%s148_s13 + $0x38] sm:$0xff]  ;;  %v169_v4 = vld [vmem:[%s148_s13 + $0x10] sm:$0xff] }
  0x14   : > { %167 = vst [vmem:[%s159_s16 + $0x10] sm:$0xff] %v163_v2  ;;  %v170_v5 = vld [vmem:[%s148_s13 + $0x18] sm:$0xff]  ;;  %168 = vst [vmem:[%s159_s16 + $0x18] sm:$0xff] %v164_v3  ;;  %v171_v6 = vld [vmem:[%s148_s13 + $0x40] sm:$0xff] }
  0x15   : > { %290 = vst [vmem:[%s159_s16 + $0x20] sm:$0xff] %v169_v4  ;;  %291 = vst [vmem:[%s159_s16 + $0x28] sm:$0xff] %v170_v5  ;;  %v172_v7 = vld [vmem:[%s148_s13 + $0x48] sm:$0xff]  ;;  %v178_v8 = vld [vmem:[%s148_s13 + $0x20] sm:$0xff] }
  0x16   : > { %292 = vst [vmem:[%s159_s16 + $0x30] sm:$0xff] %v171_v6  ;;  %293 = vst [vmem:[%s159_s16 + $0x38] sm:$0xff] %v172_v7  ;;  %v179_v9 = vld [vmem:[%s148_s13 + $0x28] sm:$0xff]  ;;  %v180_v10 = vld [vmem:[%s148_s13 + $0x50] sm:$0xff] }
  0x17   : > { %294 = vst [vmem:[%s159_s16 + $0x40] sm:$0xff] %v178_v8  ;;  %v181_v11 = vld [vmem:[%s148_s13 + $0x58] sm:$0xff]  ;;  %295 = vst [vmem:[%s159_s16 + $0x48] sm:$0xff] %v179_v9 }
  0x18   : > { %296 = vst [vmem:[%s159_s16 + $0x50] sm:$0xff] %v180_v10  ;;  %297 = vst [vmem:[%s159_s16 + $0x58] sm:$0xff] %v181_v11 }
  0x19 PF: > { %s11_s8 = sadd.s32 1, %s347_s8   ;;  %s394_s6 = smov %s343_s7 }
  0x1a   : > { %p8_p5 = scmp.ge.s32.totalorder %s11_s8, 4   ;;  %s395_s7 = smov %s397_s9 }
  0x1c   :  { %10 = sbr.rel (!%p8_p5) target bundleno = 2 (0x2), region = 56 }

</bundles_post_ra>
